<compile_context>
chip_gen: v7x
topology: tpu7x:2x2x1
jax: 0.10.0
libtpu: 0.0.40
codegen_flags: <defaults>
</compile_context>

<pallas_src>
import functools
import math

import jax
import jax.numpy as jnp
from jax.experimental import pallas as pl
from jax.experimental.pallas import tpu as pltpu

NEG_INF = -1000000000.0


# --------------------------- hardware-aware sizing -----------------------------

@functools.lru_cache(maxsize=None)
def _vmem_capacity_bytes():
    try:
        return int(pltpu.get_tpu_info().vmem_capacity_bytes)
    except Exception:
        return 128 * 1024 * 1024  # v5e/v6e default


@functools.lru_cache(maxsize=None)
def _vmem_limit_bytes():
    cap = _vmem_capacity_bytes()
    # Leave headroom for compiler-internal scratch: ~56 MiB on v7x, 112 MiB on v5e/v6e.
    return min(int(cap * 7 // 8), 112 * 1024 * 1024)


@functools.lru_cache(maxsize=None)
def _tile_limits():
    small = _vmem_capacity_bytes() <= 96 * 1024 * 1024  # v7x: 64 MiB per TC
    tq = 256 if small else 512      # attention / FFN query tile
    ts = 256 if small else 512      # LN1+QKV / vocab-projection sequence tile
    tv = 2048 if small else 4096    # vocab tile
    return tq, ts, tv


@functools.lru_cache(maxsize=None)
def _single_buffer_mode():
    """pl.Buffered(1) if this jax supports BlockSpec(pipeline_mode=...), else None."""
    try:
        mode = pl.Buffered(1)
        pl.BlockSpec((8, 128), lambda i: (0, 0), pipeline_mode=mode)  # probe
        return mode
    except Exception:
        return None


def _make_spec(shape, index_map, single=False):
    if single:
        mode = _single_buffer_mode()
        if mode is not None:
            return pl.BlockSpec(shape, index_map, pipeline_mode=mode)
    return pl.BlockSpec(shape, index_map)


def _const_spec(shape):
    # Constant-index block (weights / biases / LN params): resident once and
    # single-buffered so it does not count twice against the VMEM budget.
    return _make_spec(shape, lambda *args, _z=(0,) * len(shape): _z, single=True)


# ------------------------------ in-kernel helpers -------------------------------

def _layer_norm(x, gamma, beta, eps=1e-5):
    # x: (R, D) f32, gamma/beta: (1, D). Matches torch.nn.LayerNorm (biased var).
    mean = jnp.mean(x, axis=-1, keepdims=True)
    var = jnp.mean(jnp.square(x - mean), axis=-1, keepdims=True)
    return (x - mean) * jax.lax.rsqrt(var + eps) * gamma + beta


def _erf(x):
    # Abramowitz & Stegun 7.1.26 (|err| < 1.5e-7) -> exact-erf GELU semantics
    # (torch.nn.GELU() default) to fp32 precision. exp() runs on the EUP.
    a1, a2, a3, a4, a5 = (0.254829592, -0.284496736, 1.421413741,
                          -1.453152027, 1.061405429)
    p = 0.3275911
    ax = jnp.abs(x)
    t = 1.0 / (1.0 + p * ax)
    poly = ((((a5 * t + a4) * t + a3) * t + a2) * t + a1) * t
    y = 1.0 - poly * jnp.exp(-ax * ax)
    return jnp.where(x >= 0, y, -y)


def _gelu(x):
    return 0.5 * x * (1.0 + _erf(x * 0.7071067811865476))


# -------------------------------- Pallas kernels ---------------------------------

def ln1_qkv_kernel(x_ref, g_ref, b_ref,
                   wq_ref, bq_ref, wk_ref, bk_ref, wv_ref, bv_ref,
                   q_ref, k_ref, v_ref):
    # LN1 + full-width Q/K/V projections, computed ONCE per sequence tile
    # (bf16 operands, f32 accumulation; outputs stored bf16).
    xn = _layer_norm(x_ref[0], g_ref[...], b_ref[...]).astype(jnp.bfloat16)
    q = jnp.dot(xn, wq_ref[...], preferred_element_type=jnp.float32) + bq_ref[...]
    k = jnp.dot(xn, wk_ref[...], preferred_element_type=jnp.float32) + bk_ref[...]
    v = jnp.dot(xn, wv_ref[...], preferred_element_type=jnp.float32) + bv_ref[...]
    q_ref[0] = q.astype(jnp.bfloat16)
    k_ref[0] = k.astype(jnp.bfloat16)
    v_ref[0] = v.astype(jnp.bfloat16)


def attn_ffn_kernel(x_ref, q_ref, k_ref, v_ref,
                    wp_ref, bp_ref, ln2_g_ref, ln2_b_ref,
                    w1_ref, b1_ref, w2_ref, b2_ref,
                    out_ref, *, num_heads):
    # x_ref: (1, TQ, D) f32 residual rows; q_ref: (1, TQ, D) bf16;
    # k_ref/v_ref: (1, S, D) bf16 (full sequence for this batch element).
    x_q = x_ref[0]                                   # (TQ, D) f32
    q = q_ref[0]                                     # (TQ, D) bf16
    k = k_ref[0]                                     # (S, D)  bf16
    v = v_ref[0]                                     # (S, D)  bf16
    TQ, D = x_q.shape
    S = k.shape[0]
    Dh = D // num_heads
    scale = 1.0 / float(math.sqrt(Dh))

    q_start = pl.program_id(1) * TQ
    # In-kernel causal mask (== masked_fill(mask == 0, NEG_INF)).
    row = q_start + jax.lax.broadcasted_iota(jnp.int32, (TQ, S), 0)
    col = jax.lax.broadcasted_iota(jnp.int32, (TQ, S), 1)
    keep = row >= col

    # Per-head scores / softmax / PV (contraction dim is head_dim by
    # construction); head outputs kept as values and concatenated lane-dense.
    heads = []
    for h in range(num_heads):
        sl = slice(h * Dh, (h + 1) * Dh)
        s = jax.lax.dot_general(q[:, sl], k[:, sl], (((1,), (1,)), ((), ())),
                                preferred_element_type=jnp.float32) * scale
        s = jnp.where(keep, s, NEG_INF)
        m = jnp.max(s, axis=-1, keepdims=True)
        e = jnp.exp(s - m)
        inv = pl.reciprocal(jnp.sum(e, axis=-1, keepdims=True), approx=True)
        p = (e * inv).astype(jnp.bfloat16)
        heads.append(jnp.dot(p, v[:, sl], preferred_element_type=jnp.float32))
    o = jnp.concatenate(heads, axis=-1).astype(jnp.bfloat16)       # (TQ, D)

    # Concat-heads output projection: one (TQ,D)@(D,D) GEMM.
    attn = jnp.dot(o, wp_ref[...], preferred_element_type=jnp.float32) + bp_ref[...]

    # dropout is identity (eval / p=0)
    y = attn + x_q

    # Pre-FFN LayerNorm + FFN (Linear -> GELU -> Linear).
    yn = _layer_norm(y, ln2_g_ref[...], ln2_b_ref[...]).astype(jnp.bfloat16)
    h1 = jnp.dot(yn, w1_ref[...], preferred_element_type=jnp.float32) + b1_ref[...]
    h1 = _gelu(h1).astype(jnp.bfloat16)
    z = jnp.dot(h1, w2_ref[...], preferred_element_type=jnp.float32) + b2_ref[...]

    out_ref[0] = (z + y).astype(out_ref.dtype)


def proj_kernel(x_ref, w_ref, b_ref, out_ref):
    # x arrives bf16 (emitted by the final layer) -> astype is a no-op.
    x = x_ref[0].astype(jnp.bfloat16)
    out_ref[0] = (jnp.dot(x, w_ref[...], preferred_element_type=jnp.float32)
                  + b_ref[...])


# ----------------------------------- wrappers ------------------------------------

def ln1_qkv(x, p):
    B, S, D = x.shape
    _, ts_max, _ = _tile_limits()
    TS = min(S, ts_max)
    assert S % TS == 0, "sequence length must divide the LN/QKV tile"

    out = jax.ShapeDtypeStruct((B, S, D), jnp.bfloat16)
    seq_spec = pl.BlockSpec((1, TS, D), lambda b, si: (b, si, 0))
    return pl.pallas_call(
        ln1_qkv_kernel,
        out_shape=(out, out, out),
        grid=(B, S // TS),
        in_specs=[
            seq_spec,                                  # x
            _const_spec((1, D)), _const_spec((1, D)),  # ln1 gamma, beta
            _const_spec((D, D)), _const_spec((1, D)),  # Wq, bq
            _const_spec((D, D)), _const_spec((1, D)),  # Wk, bk
            _const_spec((D, D)), _const_spec((1, D)),  # Wv, bv
        ],
        out_specs=[seq_spec, seq_spec, seq_spec],
        compiler_params=pltpu.CompilerParams(
            dimension_semantics=("parallel", "parallel"),
            vmem_limit_bytes=_vmem_limit_bytes()),
    )(x, p["ln1_g"], p["ln1_b"], p["wq"], p["bq"], p["wk"], p["bk"],
      p["wv"], p["bv"])


def attn_ffn(x, q, k, v, p, num_heads, out_dtype):
    B, S, D = x.shape
    F = p["w1"].shape[1]
    tq_max, _, _ = _tile_limits()
    TQ = min(S, tq_max)
    assert S % TQ == 0, "sequence length must divide the query tile"

    q_spec = pl.BlockSpec((1, TQ, D), lambda b, qi: (b, qi, 0))
    kv_spec = pl.BlockSpec((1, S, D), lambda b, qi: (b, 0, 0))
    return pl.pallas_call(
        functools.partial(attn_ffn_kernel, num_heads=num_heads),
        out_shape=jax.ShapeDtypeStruct((B, S, D), out_dtype),
        grid=(B, S // TQ),
        in_specs=[
            q_spec,                                    # residual query rows (f32)
            q_spec,                                    # Q rows (bf16)
            kv_spec,                                   # K full sequence (bf16)
            kv_spec,                                   # V full sequence (bf16)
            _const_spec((D, D)), _const_spec((1, D)),  # Wproj, bproj
            _const_spec((1, D)), _const_spec((1, D)),  # ln2 gamma, beta
            _const_spec((D, F)), _const_spec((1, F)),  # FFN W1, b1
            _const_spec((F, D)), _const_spec((1, D)),  # FFN W2, b2
        ],
        out_specs=q_spec,
        compiler_params=pltpu.CompilerParams(
            dimension_semantics=("parallel", "parallel"),
            vmem_limit_bytes=_vmem_limit_bytes()),
    )(x, q, k, v,
      p["wp"], p["bp"], p["ln2_g"], p["ln2_b"],
      p["w1"], p["b1"], p["w2"], p["b2"])


def output_projection(x, w, b):
    B, S, D = x.shape
    V = w.shape[1]
    _, ts_max, tv_max = _tile_limits()
    TS = min(S, ts_max)
    TV = min(V, tv_max)
    assert S % TS == 0 and V % TV == 0, "seq/vocab must divide their tiles"

    return pl.pallas_call(
        proj_kernel,
        out_shape=jax.ShapeDtypeStruct((B, S, V), jnp.float32),
        grid=(B, S // TS, V // TV),
        in_specs=[
            # activation block is constant across the vocab axis -> single buffer
            _make_spec((1, TS, D), lambda b, si, vi: (b, si, 0), single=True),
            pl.BlockSpec((D, TV), lambda b, si, vi: (0, vi)),
            pl.BlockSpec((1, TV), lambda b, si, vi: (0, vi)),
        ],
        out_specs=pl.BlockSpec((1, TS, TV), lambda b, si, vi: (b, si, vi)),
        compiler_params=pltpu.CompilerParams(
            dimension_semantics=("parallel", "parallel", "parallel"),
            vmem_limit_bytes=_vmem_limit_bytes()),
    )(x, w, b)


def transformer_forward(tokens, params, num_heads):
    """tokens: (B, S) int32 ids -> logits (B, S, vocab) float32."""
    x = jnp.take(params["embed"], tokens, axis=0)      # embedding gather (glue)
    n_layers = len(params["layers"])
    for i, lp in enumerate(params["layers"]):
        q, k, v = ln1_qkv(x, lp)
        out_dtype = jnp.bfloat16 if i == n_layers - 1 else jnp.float32
        x = attn_ffn(x, q, k, v, lp, num_heads, out_dtype)
    # final dropout is identity (eval / p=0)
    # TODO(synk): cross-pallas_call weight prefetch (P10) to hide per-layer weight
    # DMA in latency-bound regimes on v7x.
    return output_projection(x, params["proj_w"], params["proj_b"])


# -------------------------------- parameter setup ---------------------------------

def init_transformer_params(key, num_layers, hidden_dim, ffn_size, heads, vocab_size):
    # Linear weights stored as (in, out) so kernels compute y = x @ W + b
    # (transpose of torch's (out, in) storage; same math). Weights in bf16
    # (MXU operands), biases / LN params / embedding in f32.
    def nrm(k, shape, scale=0.05, dtype=jnp.bfloat16):
        return (scale * jax.random.normal(k, shape, jnp.float32)).astype(dtype)

    keys = iter(jax.random.split(key, num_layers * 9 + 2))
    layers = []
    for _ in range(num_layers):
        layers.append(dict(
            ln1_g=jnp.ones((1, hidden_dim), jnp.float32),
            ln1_b=jnp.zeros((1, hidden_dim), jnp.float32),
            # per-head Q/K/V weights concatenated along the output dim -> (D, D)
            wq=nrm(next(keys), (hidden_dim, hidden_dim)),
            bq=nrm(next(keys), (1, hidden_dim), dtype=jnp.float32),
            wk=nrm(next(keys), (hidden_dim, hidden_dim)),
            bk=nrm(next(keys), (1, hidden_dim), dtype=jnp.float32),
            wv=nrm(next(keys), (hidden_dim, hidden_dim)),
            bv=nrm(next(keys), (1, hidden_dim), dtype=jnp.float32),
            wp=nrm(next(keys), (hidden_dim, hidden_dim)),
            bp=jnp.zeros((1, hidden_dim), jnp.float32),
            ln2_g=jnp.ones((1, hidden_dim), jnp.float32),
            ln2_b=jnp.zeros((1, hidden_dim), jnp.float32),
            w1=nrm(next(keys), (hidden_dim, ffn_size)),
            b1=jnp.zeros((1, ffn_size), jnp.float32),
            w2=nrm(next(keys), (ffn_size, hidden_dim)),
            b2=jnp.zeros((1, hidden_dim), jnp.float32),
        ))
    return dict(
        embed=nrm(next(keys), (vocab_size, hidden_dim), 1.0, dtype=jnp.float32),
        proj_w=nrm(next(keys), (hidden_dim, vocab_size)),
        proj_b=jnp.zeros((1, vocab_size), jnp.float32),
        layers=layers,
    )


# -------------------------------------- main ---------------------------------------

if __name__ == "__main__":
    LAYERS, HIDDEN, FFN, HEADS, VOCAB = 2, 32, 64, 4, 64
    B, S = 2, 8

    key = jax.random.PRNGKey(0)
    pkey, tkey = jax.random.split(key)
    params = init_transformer_params(pkey, LAYERS, HIDDEN, FFN, HEADS, VOCAB)
    tokens = jax.random.randint(tkey, (B, S), 0, VOCAB, dtype=jnp.int32)

    logits = transformer_forward(tokens, params, HEADS)
    jax.block_until_ready(logits)
    assert logits.shape == (B, S, VOCAB)
    assert bool(jnp.all(jnp.isfinite(logits)))
    print("KERNEL_OK")
</pallas_src>

<mosaic_0001>
module attributes {stable_mosaic.version = 11 : i64} {
  func.func @ln1_qkv_kernel(%arg0: i32, %arg1: i32, %arg2: memref<1x8x32xf32, #tpu.memory_space<vmem>>, %arg3: memref<1x32xf32, #tpu.memory_space<vmem>>, %arg4: memref<1x32xf32, #tpu.memory_space<vmem>>, %arg5: memref<32x32xbf16, #tpu.memory_space<vmem>>, %arg6: memref<1x32xf32, #tpu.memory_space<vmem>>, %arg7: memref<32x32xbf16, #tpu.memory_space<vmem>>, %arg8: memref<1x32xf32, #tpu.memory_space<vmem>>, %arg9: memref<32x32xbf16, #tpu.memory_space<vmem>>, %arg10: memref<1x32xf32, #tpu.memory_space<vmem>>, %arg11: memref<1x8x32xbf16, #tpu.memory_space<vmem>>, %arg12: memref<1x8x32xbf16, #tpu.memory_space<vmem>>, %arg13: memref<1x8x32xbf16, #tpu.memory_space<vmem>>) attributes {dimension_semantics = [#tpu.dimension_semantics<parallel>, #tpu.dimension_semantics<parallel>], iteration_bounds = array<i64: 2, 1>, scalar_prefetch = 0 : i64, scratch_operands = 0 : i64, tpu.core_type = #tpu.core_type<tc>, window_params = [{transform_indices = @transform_0, window_bounds = array<i64: 1, 8, 32>}, {pipeline_mode = #tpu.pipeline_mode<synchronous>, transform_indices = @transform_1, window_bounds = array<i64: 1, 32>}, {pipeline_mode = #tpu.pipeline_mode<synchronous>, transform_indices = @transform_2, window_bounds = array<i64: 1, 32>}, {pipeline_mode = #tpu.pipeline_mode<synchronous>, transform_indices = @transform_3, window_bounds = array<i64: 32, 32>}, {pipeline_mode = #tpu.pipeline_mode<synchronous>, transform_indices = @transform_4, window_bounds = array<i64: 1, 32>}, {pipeline_mode = #tpu.pipeline_mode<synchronous>, transform_indices = @transform_5, window_bounds = array<i64: 32, 32>}, {pipeline_mode = #tpu.pipeline_mode<synchronous>, transform_indices = @transform_6, window_bounds = array<i64: 1, 32>}, {pipeline_mode = #tpu.pipeline_mode<synchronous>, transform_indices = @transform_7, window_bounds = array<i64: 32, 32>}, {pipeline_mode = #tpu.pipeline_mode<synchronous>, transform_indices = @transform_8, window_bounds = array<i64: 1, 32>}, {transform_indices = @transform_9, window_bounds = array<i64: 1, 8, 32>}, {transform_indices = @transform_10, window_bounds = array<i64: 1, 8, 32>}, {transform_indices = @transform_11, window_bounds = array<i64: 1, 8, 32>}]} {
    %c0 = arith.constant 0 : index
    %c0_0 = arith.constant 0 : index
    %c0_1 = arith.constant 0 : index
    %0 = vector.load %arg2[%c0, %c0_0, %c0_1] : memref<1x8x32xf32, #tpu.memory_space<vmem>>, vector<1x8x32xf32>
    %1 = vector.shape_cast %0 : vector<1x8x32xf32> to vector<8x32xf32>
    %c0_2 = arith.constant 0 : index
    %c0_3 = arith.constant 0 : index
    %2 = vector.load %arg3[%c0_2, %c0_3] : memref<1x32xf32, #tpu.memory_space<vmem>>, vector<1x32xf32>
    %c0_4 = arith.constant 0 : index
    %c0_5 = arith.constant 0 : index
    %3 = vector.load %arg4[%c0_4, %c0_5] : memref<1x32xf32, #tpu.memory_space<vmem>>, vector<1x32xf32>
    %cst = arith.constant dense<0.000000e+00> : vector<8xf32>
    %4 = vector.multi_reduction <add>, %1, %cst [1] : vector<8x32xf32> to vector<8xf32>
    %5 = vector.shape_cast %4 : vector<8xf32> to vector<8x1xf32>
    %cst_6 = arith.constant 3.200000e+01 : f32
    %6 = vector.broadcast %cst_6 : f32 to vector<8x1xf32>
    %7 = arith.divf %5, %6 : vector<8x1xf32>
    %8 = vector.broadcast %7 : vector<8x1xf32> to vector<8x32xf32>
    %9 = arith.subf %1, %8 : vector<8x32xf32>
    %10 = arith.mulf %9, %9 : vector<8x32xf32>
    %cst_7 = arith.constant dense<0.000000e+00> : vector<8xf32>
    %11 = vector.multi_reduction <add>, %10, %cst_7 [1] : vector<8x32xf32> to vector<8xf32>
    %12 = vector.shape_cast %11 : vector<8xf32> to vector<8x1xf32>
    %cst_8 = arith.constant 3.200000e+01 : f32
    %13 = vector.broadcast %cst_8 : f32 to vector<8x1xf32>
    %14 = arith.divf %12, %13 : vector<8x1xf32>
    %15 = vector.broadcast %7 : vector<8x1xf32> to vector<8x32xf32>
    %16 = arith.subf %1, %15 : vector<8x32xf32>
    %cst_9 = arith.constant 9.99999974E-6 : f32
    %17 = vector.broadcast %cst_9 : f32 to vector<8x1xf32>
    %18 = arith.addf %14, %17 : vector<8x1xf32>
    %19 = math.rsqrt %18 : vector<8x1xf32>
    %20 = vector.broadcast %19 : vector<8x1xf32> to vector<8x32xf32>
    %21 = arith.mulf %16, %20 : vector<8x32xf32>
    %22 = vector.broadcast %2 : vector<1x32xf32> to vector<8x32xf32>
    %23 = arith.mulf %21, %22 : vector<8x32xf32>
    %24 = vector.broadcast %3 : vector<1x32xf32> to vector<8x32xf32>
    %25 = arith.addf %23, %24 : vector<8x32xf32>
    %26 = arith.truncf %25 : vector<8x32xf32> to vector<8x32xbf16>
    %c0_10 = arith.constant 0 : index
    %c0_11 = arith.constant 0 : index
    %27 = vector.load %arg5[%c0_10, %c0_11] : memref<32x32xbf16, #tpu.memory_space<vmem>>, vector<32x32xbf16>
    %cst_12 = arith.constant dense<0.000000e+00> : vector<8x32xf32>
    %28 = tpu.matmul %26, %27, %cst_12 {dimension_numbers = #tpu.dot_dimension_numbers<[1], [0], [0], [1], [0, 0, 1, 1], [], []>} : vector<8x32xbf16>, vector<32x32xbf16>, vector<8x32xf32> -> vector<8x32xf32>
    %c0_13 = arith.constant 0 : index
    %c0_14 = arith.constant 0 : index
    %29 = vector.load %arg6[%c0_13, %c0_14] : memref<1x32xf32, #tpu.memory_space<vmem>>, vector<1x32xf32>
    %30 = vector.broadcast %29 : vector<1x32xf32> to vector<8x32xf32>
    %31 = arith.addf %28, %30 : vector<8x32xf32>
    %c0_15 = arith.constant 0 : index
    %c0_16 = arith.constant 0 : index
    %32 = vector.load %arg7[%c0_15, %c0_16] : memref<32x32xbf16, #tpu.memory_space<vmem>>, vector<32x32xbf16>
    %cst_17 = arith.constant dense<0.000000e+00> : vector<8x32xf32>
    %33 = tpu.matmul %26, %32, %cst_17 {dimension_numbers = #tpu.dot_dimension_numbers<[1], [0], [0], [1], [0, 0, 1, 1], [], []>} : vector<8x32xbf16>, vector<32x32xbf16>, vector<8x32xf32> -> vector<8x32xf32>
    %c0_18 = arith.constant 0 : index
    %c0_19 = arith.constant 0 : index
    %34 = vector.load %arg8[%c0_18, %c0_19] : memref<1x32xf32, #tpu.memory_space<vmem>>, vector<1x32xf32>
    %35 = vector.broadcast %34 : vector<1x32xf32> to vector<8x32xf32>
    %36 = arith.addf %33, %35 : vector<8x32xf32>
    %c0_20 = arith.constant 0 : index
    %c0_21 = arith.constant 0 : index
    %37 = vector.load %arg9[%c0_20, %c0_21] : memref<32x32xbf16, #tpu.memory_space<vmem>>, vector<32x32xbf16>
    %cst_22 = arith.constant dense<0.000000e+00> : vector<8x32xf32>
    %38 = tpu.matmul %26, %37, %cst_22 {dimension_numbers = #tpu.dot_dimension_numbers<[1], [0], [0], [1], [0, 0, 1, 1], [], []>} : vector<8x32xbf16>, vector<32x32xbf16>, vector<8x32xf32> -> vector<8x32xf32>
    %c0_23 = arith.constant 0 : index
    %c0_24 = arith.constant 0 : index
    %39 = vector.load %arg10[%c0_23, %c0_24] : memref<1x32xf32, #tpu.memory_space<vmem>>, vector<1x32xf32>
    %40 = vector.broadcast %39 : vector<1x32xf32> to vector<8x32xf32>
    %41 = arith.addf %38, %40 : vector<8x32xf32>
    %42 = arith.truncf %31 : vector<8x32xf32> to vector<8x32xbf16>
    %c0_25 = arith.constant 0 : index
    %c0_26 = arith.constant 0 : index
    %c0_27 = arith.constant 0 : index
    %43 = vector.load %arg11[%c0_25, %c0_26, %c0_27] : memref<1x8x32xbf16, #tpu.memory_space<vmem>>, vector<1x8x32xbf16>
    %44 = vector.shape_cast %43 : vector<1x8x32xbf16> to vector<8x32xbf16>
    %45 = vector.shape_cast %42 : vector<8x32xbf16> to vector<1x8x32xbf16>
    tpu.vector_store %arg11[%c0_25, %c0_26, %c0_27], %45 {strides = array<i32>} : memref<1x8x32xbf16, #tpu.memory_space<vmem>>, vector<1x8x32xbf16>,
    %46 = arith.truncf %36 : vector<8x32xf32> to vector<8x32xbf16>
    %c0_28 = arith.constant 0 : index
    %c0_29 = arith.constant 0 : index
    %c0_30 = arith.constant 0 : index
    %47 = vector.load %arg12[%c0_28, %c0_29, %c0_30] : memref<1x8x32xbf16, #tpu.memory_space<vmem>>, vector<1x8x32xbf16>
    %48 = vector.shape_cast %47 : vector<1x8x32xbf16> to vector<8x32xbf16>
    %49 = vector.shape_cast %46 : vector<8x32xbf16> to vector<1x8x32xbf16>
    tpu.vector_store %arg12[%c0_28, %c0_29, %c0_30], %49 {strides = array<i32>} : memref<1x8x32xbf16, #tpu.memory_space<vmem>>, vector<1x8x32xbf16>,
    %50 = arith.truncf %41 : vector<8x32xf32> to vector<8x32xbf16>
    %c0_31 = arith.constant 0 : index
    %c0_32 = arith.constant 0 : index
    %c0_33 = arith.constant 0 : index
    %51 = vector.load %arg13[%c0_31, %c0_32, %c0_33] : memref<1x8x32xbf16, #tpu.memory_space<vmem>>, vector<1x8x32xbf16>
    %52 = vector.shape_cast %51 : vector<1x8x32xbf16> to vector<8x32xbf16>
    %53 = vector.shape_cast %50 : vector<8x32xbf16> to vector<1x8x32xbf16>
    tpu.vector_store %arg13[%c0_31, %c0_32, %c0_33], %53 {strides = array<i32>} : memref<1x8x32xbf16, #tpu.memory_space<vmem>>, vector<1x8x32xbf16>,
    return
  }
  func.func @transform_0(%arg0: i32, %arg1: i32) -> (i32, i32, i32) {
    %c0_i32 = arith.constant 0 : i32
    %c0_i32_0 = arith.constant 0 : i32
    return %arg0, %arg1, %c0_i32 : i32, i32, i32
  }
  func.func @transform_1(%arg0: i32, %arg1: i32) -> (i32, i32) {
    %c0_i32 = arith.constant 0 : i32
    %c0_i32_0 = arith.constant 0 : i32
    %c0_i32_1 = arith.constant 0 : i32
    return %c0_i32, %c0_i32_0 : i32, i32
  }
  func.func @transform_2(%arg0: i32, %arg1: i32) -> (i32, i32) {
    %c0_i32 = arith.constant 0 : i32
    %c0_i32_0 = arith.constant 0 : i32
    %c0_i32_1 = arith.constant 0 : i32
    return %c0_i32, %c0_i32_0 : i32, i32
  }
  func.func @transform_3(%arg0: i32, %arg1: i32) -> (i32, i32) {
    %c0_i32 = arith.constant 0 : i32
    %c0_i32_0 = arith.constant 0 : i32
    %c0_i32_1 = arith.constant 0 : i32
    return %c0_i32, %c0_i32_0 : i32, i32
  }
  func.func @transform_4(%arg0: i32, %arg1: i32) -> (i32, i32) {
    %c0_i32 = arith.constant 0 : i32
    %c0_i32_0 = arith.constant 0 : i32
    %c0_i32_1 = arith.constant 0 : i32
    return %c0_i32, %c0_i32_0 : i32, i32
  }
  func.func @transform_5(%arg0: i32, %arg1: i32) -> (i32, i32) {
    %c0_i32 = arith.constant 0 : i32
    %c0_i32_0 = arith.constant 0 : i32
    %c0_i32_1 = arith.constant 0 : i32
    return %c0_i32, %c0_i32_0 : i32, i32
  }
  func.func @transform_6(%arg0: i32, %arg1: i32) -> (i32, i32) {
    %c0_i32 = arith.constant 0 : i32
    %c0_i32_0 = arith.constant 0 : i32
    %c0_i32_1 = arith.constant 0 : i32
    return %c0_i32, %c0_i32_0 : i32, i32
  }
  func.func @transform_7(%arg0: i32, %arg1: i32) -> (i32, i32) {
    %c0_i32 = arith.constant 0 : i32
    %c0_i32_0 = arith.constant 0 : i32
    %c0_i32_1 = arith.constant 0 : i32
    return %c0_i32, %c0_i32_0 : i32, i32
  }
  func.func @transform_8(%arg0: i32, %arg1: i32) -> (i32, i32) {
    %c0_i32 = arith.constant 0 : i32
    %c0_i32_0 = arith.constant 0 : i32
    %c0_i32_1 = arith.constant 0 : i32
    return %c0_i32, %c0_i32_0 : i32, i32
  }
  func.func @transform_9(%arg0: i32, %arg1: i32) -> (i32, i32, i32) {
    %c0_i32 = arith.constant 0 : i32
    %c0_i32_0 = arith.constant 0 : i32
    return %arg0, %arg1, %c0_i32 : i32, i32, i32
  }
  func.func @transform_10(%arg0: i32, %arg1: i32) -> (i32, i32, i32) {
    %c0_i32 = arith.constant 0 : i32
    %c0_i32_0 = arith.constant 0 : i32
    return %arg0, %arg1, %c0_i32 : i32, i32, i32
  }
  func.func @transform_11(%arg0: i32, %arg1: i32) -> (i32, i32, i32) {
    %c0_i32 = arith.constant 0 : i32
    %c0_i32_0 = arith.constant 0 : i32
    return %arg0, %arg1, %c0_i32 : i32, i32, i32
  }
}

</mosaic_0001>

<bundles_post_ra>
// kernel: tpu_custom_call.1
= control target key start
LH: loop header
LB: loop body
LE: loop exit
PB: predicated region body
PF: predicated region fallthrough
CT: control target
= control target key end

     0   :  { %s2243_s0 = inlined_call_operand.hbm [shape: f32[2,8,32], index: 0, kind: input, shape index: {}]   ;;  %s2244_s1 = inlined_call_operand.hbm [shape: f32[1,32], index: 1, kind: input, shape index: {}]   ;;  %s2245_s2 = inlined_call_operand.hbm [shape: f32[1,32], index: 2, kind: input, shape index: {}]   ;;  %s2246_s3 = inlined_call_operand.hbm [shape: bf16[32,32], index: 3, kind: input, shape index: {}]   ;;  %s2247_s4 = inlined_call_operand.hbm [shape: f32[1,32], index: 4, kind: input, shape index: {}]   ;;  %s2248_s5 = inlined_call_operand.hbm [shape: bf16[32,32], index: 5, kind: input, shape index: {}]   ;;  %s2249_s6 = inlined_call_operand.hbm [shape: f32[1,32], index: 6, kind: input, shape index: {}]   ;;  %s2250_s7 = inlined_call_operand.hbm [shape: bf16[32,32], index: 7, kind: input, shape index: {}]   ;;  %s2251_s8 = inlined_call_operand.hbm [shape: f32[1,32], index: 8, kind: input, shape index: {}]   ;;  %s2252_s9 = inlined_call_operand.hbm [shape: bf16[2,8,32], index: 9, kind: output, shape index: {0}]   ;;  %s2253_s10 = inlined_call_operand.hbm [shape: bf16[2,8,32], index: 10, kind: output, shape index: {1}]   ;;  %s2254_s11 = inlined_call_operand.hbm [shape: bf16[2,8,32], index: 11, kind: output, shape index: {2}]  }
   0x1   :  { %2262 = sst [smem:[#allocation29_spill]] %s2243_s0 }
   0x2   :  { %2263 = sst [smem:[#allocation30_spill]] %s2244_s1 }
   0x3   :  { %2264 = sst [smem:[#allocation31_spill]] %s2245_s2 }
   0x4   :  { %2265 = sst [smem:[#allocation32_spill]] %s2246_s3 }
   0x5   :  { %2266 = sst [smem:[#allocation33_spill]] %s2247_s4 }
   0x6   :  { %2267 = sst [smem:[#allocation34_spill]] %s2252_s9 }
   0x7   :  { %2268 = sst [smem:[#allocation35_spill]] %s2253_s10 }
   0x8   :  { %2269 = sst [smem:[#allocation36_spill]] %s2254_s11 }
   0x9   :  { %17 = vsyncpa [#allocation3], 0 }
   0xa   :  { %19 = vsyncpa [#allocation3 + $0x1], 0 }
   0xb   :  { %20 = vsyncpa [#allocation6], 0 }
   0xc   :  { %21 = vsyncpa [#allocation9], 0 }
   0xd   :  { %22 = vsyncpa [#allocation12], 0 }
   0xe   :  { %23 = vsyncpa [#allocation15], 0 }
   0xf   :  { %24 = vsyncpa [#allocation4], 0 }
  0x10   :  { %26 = vsyncpa [#allocation4 + $0x1], 0 }
  0x11   :  { %27 = vsyncpa [#allocation19], 0 }
  0x12   :  { %29 = vsyncpa [#allocation19 + $0x1], 0  ;;  %s1789_s17 = smov 0   ;;  %s1791_s18 = smov 0  }
  0x13   :  { %s1793_s19 = smov 0   ;;  %s1795_s20 = smov 0  }
  0x14   :  { %s1797_s21 = smov 0   ;;  %s1799_s22 = smov 0  }
  0x15 LB: > { %2270 = sst [smem:[#allocation28_spill]] %s1703_s20  ;;  %s1820_s23 = sadd.s32 4294967295, %s1711_s22   ;;  %s1711_s22 = sphi %s1799_s22, %s35_s22   ;;  %s1707_s21 = sphi %s1797_s21, %s2306_s21   ;;  %s1703_s20 = sphi %s1795_s20, %s2305_s20   ;;  %s1699_s19 = sphi %s1793_s19, %s2304_s19   ;;  %s1695_s18 = sphi %s1791_s18, %s2303_s18   ;;  %s1691_s17 = sphi %s1789_s17, %s2302_s17  }
  0x16   : > { %p1054_p0 = scmp.ge.s32.totalorder %s1711_s22, 1  ;;  %p2256_p1 = scmp.eq.s32.totalorder %s1820_s23, 0 }
  0x17   : > { %p332_p2 = scmp.lt.s32.totalorder %s1711_s22, 3  ;;  %s1713_s25 = smov [#allocation5]  }
  0x18   : > { %s345_s26 = sshll.u32 %s1713_s25, 4  ;;  %s1714_s27 = smov [#allocation8]   ;;  %s346_s26 = int_to_ptr.vmem [resolvable:$true] %s345_s26 }
  0x19   : > { %p1825_p3 = pnand %p1054_p0, %p332_p2  ;;  %s366_s28 = sshll.u32 %s1714_s27, 4  ;;  %s1838_s28 = int_to_ptr.vmem [resolvable:$true] %s366_s28 }
  0x1a   : > { %s1715_s30 = smov [#allocation11]   ;;  %s2273_s1 = sld [smem:[#allocation30_spill]] }
  0x1b   : > { %s2271_s24 = scalar_select %p1825_p3, 1, 0 }
  0x1c   : > { %p1174_p5 = pneg %p1825_p3  ;;  %s1840_s12 = sshll.u32 %s1715_s30, 4  ;;  %s391_s12 = int_to_ptr.vmem [resolvable:$true] %s1840_s12 }
  0x1e   : > { %p1834_p6 = pnand %p1174_p5, %p2256_p1 }
  0x20   : > { %s1299_s15 = scalar_lea.hbm %s2273_s1, 16  ;;  %p1850_p8 = pneg %p1834_p6 }
  0x21   : > { %p1300_p7 = scmp.ne.s32.totalorder %s2273_s1, %s1299_s15  ;;  %p1306_p11 = scmp.lt.u32.totalorder %s1299_s15, %s2273_s1 }
  0x23   : > { %p1302_p9 = pnand %p1850_p8, %p1300_p7 }
  0x25   : > { %p1303_p10 = pneg %p1302_p9 }
  0x27   : > { %p1308_p12 = pnand %p1306_p11, %p1303_p10 }
  0x29   : > { %1311 = shalt.err (!%p1308_p12)
}
  0x2a   : > { %s1312_s13 = scalar_lea.vmem %s346_s26, 16  ;;  %s1319_s14 = scalar_lea.vmem %s346_s26, 32 }
  0x2b   : > { %p1313_p13 = scmp.ne.s32.totalorder %s346_s26, %s1312_s13  ;;  %p1320_p5 = scmp.lt.s32.totalorder %s346_s26, %s346_s26 }
  0x2c   : > { %p1321_p4 = scmp.lt.s32.totalorder %s1319_s14, %s1312_s13 }
  0x2d   : > { %p1315_p0 = pnand %p1313_p13, %p1850_p8 }
  0x2e   : > { %p1322_p1 = por %p1321_p4, %p1320_p5 }
  0x2f   : > { %p1316_p2 = pneg %p1315_p0 }
  0x31   : > { %p1323_p3 = pnand %p1322_p1, %p1316_p2 }
  0x33   : > { %1326 = shalt.err (!%p1323_p3)
}
  0x34   : > { %1177 = dma.hbm_to_vmem [thread:$0]  (!%p1834_p6), %s2273_s1, 16, %s346_s26, [#allocation6]  }
  0x35   : > { %s2275_s3 = sld [smem:[#allocation32_spill]] }
  0x3b   : > { %s1327_s30 = scalar_lea.hbm %s2275_s3, 256 }
  0x3c   : > { %p1328_p7 = scmp.ne.s32.totalorder %s2275_s3, %s1327_s30  ;;  %p1334_p1 = scmp.lt.u32.totalorder %s1327_s30, %s2275_s3 }
  0x3e   : > { %p1330_p9 = pnand %p1328_p7, %p1850_p8 }
  0x40   : > { %p1331_p4 = pneg %p1330_p9 }
  0x42   : > { %p1336_p3 = pnand %p1334_p1, %p1331_p4 }
  0x44   : > { %1339 = shalt.err (!%p1336_p3)
}
  0x45   : > { %s1340_s26 = scalar_lea.vmem %s1838_s28, 256  ;;  %p1348_p13 = scmp.lt.s32.totalorder %s1838_s28, %s1838_s28 }
  0x46   : > { %p1341_p10 = scmp.ne.s32.totalorder %s1838_s28, %s1340_s26  ;;  %p1349_p0 = scmp.lt.s32.totalorder %s1340_s26, %s1340_s26 }
  0x48   : > { %p1343_p11 = pnand %p1341_p10, %p1850_p8  ;;  %p1350_p2 = por %p1349_p0, %p1348_p13 }
  0x4a   : > { %p1344_p12 = pneg %p1343_p11 }
  0x4c   : > { %p1351_p5 = pnand %p1350_p2, %p1344_p12 }
  0x4e   : > { %1354 = shalt.err (!%p1351_p5)
}
  0x4f   : > { %s1716_s9 = smov 64   ;;  %s1717_s10 = smov 4  }
  0x50   : > { %1183 = dma.hbm_to_vmem [thread:$0]  (!%p1834_p6), %s2275_s3, 256, %s1838_s28, [#allocation9], %s1716_s9, %s1716_s9, %s1717_s10  }
  0x51   : > { %s1355_s30 = scalar_lea.hbm %s2248_s5, 256 }
  0x52   : > { %p1356_p7 = scmp.ne.s32.totalorder %s2248_s5, %s1355_s30  ;;  %p1362_p1 = scmp.lt.u32.totalorder %s1355_s30, %s2248_s5 }
  0x54   : > { %p1358_p9 = pnand %p1356_p7, %p1850_p8 }
  0x56   : > { %p1359_p4 = pneg %p1358_p9 }
  0x58   : > { %p1364_p3 = pnand %p1362_p1, %p1359_p4 }
  0x5a   : > { %1367 = shalt.err (!%p1364_p3)
}
  0x5b   : > { %s1368_s16 = scalar_lea.vmem %s391_s12, 256  ;;  %p1376_p13 = scmp.lt.s32.totalorder %s391_s12, %s391_s12 }
  0x5c   : > { %p1369_p10 = scmp.ne.s32.totalorder %s391_s12, %s1368_s16  ;;  %p1377_p0 = scmp.lt.s32.totalorder %s1368_s16, %s1368_s16 }
  0x5e   : > { %p1371_p11 = pnand %p1369_p10, %p1850_p8  ;;  %p1378_p2 = por %p1377_p0, %p1376_p13 }
  0x60   : > { %p1372_p12 = pneg %p1371_p11 }
  0x62   : > { %p1379_p5 = pnand %p1378_p2, %p1372_p12 }
  0x64   : > { %1382 = shalt.err (!%p1379_p5)
}
  0x65   : > { %1189 = dma.hbm_to_vmem [thread:$0]  (!%p1834_p6), %s2248_s5, 256, %s391_s12, [#allocation12], %s1716_s9, %s1716_s9, %s1717_s10  }
  0x66   : > { %s1718_s25 = smov [#allocation14]   ;;  %s1719_s15 = smov [#allocation7]  }
  0x67   : > { %s414_s11 = sshll.u32 %s1718_s25, 4  ;;  %s356_s30 = sshll.u32 %s1719_s15, 4  ;;  %s415_s11 = int_to_ptr.vmem [resolvable:$true] %s414_s11  ;;  %s357_s30 = int_to_ptr.vmem [resolvable:$true] %s356_s30 }
  0x68   : > { %s1383_s26 = scalar_lea.hbm %s2250_s7, 256 }
  0x69   : > { %p1384_p7 = scmp.ne.s32.totalorder %s2250_s7, %s1383_s26  ;;  %p1390_p1 = scmp.lt.u32.totalorder %s1383_s26, %s2250_s7 }
  0x6b   : > { %p1386_p9 = pnand %p1384_p7, %p1850_p8 }
  0x6d   : > { %p1387_p4 = pneg %p1386_p9 }
  0x6f   : > { %p1392_p3 = pnand %p1390_p1, %p1387_p4 }
  0x71   : > { %1395 = shalt.err (!%p1392_p3)
}
  0x72   : > { %s1396_s12 = scalar_lea.vmem %s415_s11, 256  ;;  %p1404_p13 = scmp.lt.s32.totalorder %s415_s11, %s415_s11 }
  0x73   : > { %p1397_p10 = scmp.ne.s32.totalorder %s415_s11, %s1396_s12  ;;  %p1405_p0 = scmp.lt.s32.totalorder %s1396_s12, %s1396_s12 }
  0x75   : > { %p1399_p11 = pnand %p1397_p10, %p1850_p8  ;;  %p1406_p2 = por %p1405_p0, %p1404_p13 }
  0x77   : > { %p1400_p12 = pneg %p1399_p11 }
  0x79   : > { %p1407_p5 = pnand %p1406_p2, %p1400_p12 }
  0x7b   : > { %1410 = shalt.err (!%p1407_p5)
}
  0x7c   : > { %1195 = dma.hbm_to_vmem [thread:$0]  (!%p1834_p6), %s2250_s7, 256, %s415_s11, [#allocation15], %s1716_s9, %s1716_s9, %s1717_s10  }
  0x7d   : > { %s2276_s2 = sld [smem:[#allocation31_spill]] }
  0x83   : > { %s1411_s15 = scalar_lea.hbm %s2276_s2, 16 }
  0x84   : > { %p1412_p7 = scmp.ne.s32.totalorder %s2276_s2, %s1411_s15  ;;  %p1418_p1 = scmp.lt.u32.totalorder %s1411_s15, %s2276_s2 }
  0x86   : > { %p1414_p9 = pnand %p1412_p7, %p1850_p8 }
  0x88   : > { %p1415_p4 = pneg %p1414_p9 }
  0x8a   : > { %p1420_p3 = pnand %p1418_p1, %p1415_p4 }
  0x8c   : > { %1423 = shalt.err (!%p1420_p3)
}
  0x8d   : > { %s1424_s1 = scalar_lea.vmem %s357_s30, 16  ;;  %s1431_s9 = scalar_lea.vmem %s357_s30, 32 }
  0x8e   : > { %p1425_p10 = scmp.ne.s32.totalorder %s357_s30, %s1424_s1  ;;  %p1432_p13 = scmp.lt.s32.totalorder %s357_s30, %s357_s30 }
  0x8f   : > { %p1433_p0 = scmp.lt.s32.totalorder %s1431_s9, %s1424_s1 }
  0x90   : > { %p1427_p11 = pnand %p1425_p10, %p1850_p8 }
  0x91   : > { %p1434_p2 = por %p1433_p0, %p1432_p13 }
  0x92   : > { %p1428_p12 = pneg %p1427_p11 }
  0x94   : > { %p1435_p5 = pnand %p1434_p2, %p1428_p12 }
  0x96   : > { %1438 = shalt.err (!%p1435_p5)
}
  0x97   : > { %1180 = dma.hbm_to_vmem [thread:$0]  (!%p1834_p6), %s2276_s2, 16, %s357_s30, [#allocation6]  }
  0x98   : > { %s1720_s12 = smov [#allocation10]   ;;  %s1721_s20 = smov [#allocation13]  }
  0x99   : > { %s380_s3 = sshll.u32 %s1720_s12, 4  ;;  %s404_s28 = sshll.u32 %s1721_s20, 4  ;;  %s381_s3 = int_to_ptr.vmem [resolvable:$true] %s380_s3  ;;  %s405_s28 = int_to_ptr.vmem [resolvable:$true] %s404_s28 }
  0x9a   : > { %s2277_s4 = sld [smem:[#allocation33_spill]] }
  0xa0   : > { %s1439_s13 = scalar_lea.hbm %s2277_s4, 16 }
  0xa1   : > { %p1440_p7 = scmp.ne.s32.totalorder %s2277_s4, %s1439_s13  ;;  %p1446_p1 = scmp.lt.u32.totalorder %s1439_s13, %s2277_s4 }
  0xa3   : > { %p1442_p9 = pnand %p1440_p7, %p1850_p8 }
  0xa5   : > { %p1443_p4 = pneg %p1442_p9 }
  0xa7   : > { %p1448_p3 = pnand %p1446_p1, %p1443_p4 }
  0xa9   : > { %1451 = shalt.err (!%p1448_p3)
}
  0xaa   : > { %s1452_s30 = scalar_lea.vmem %s381_s3, 16  ;;  %s1459_s9 = scalar_lea.vmem %s381_s3, 32 }
  0xab   : > { %p1453_p10 = scmp.ne.s32.totalorder %s381_s3, %s1452_s30  ;;  %p1460_p13 = scmp.lt.s32.totalorder %s381_s3, %s381_s3 }
  0xac   : > { %p1461_p0 = scmp.lt.s32.totalorder %s1459_s9, %s1452_s30 }
  0xad   : > { %p1455_p11 = pnand %p1453_p10, %p1850_p8 }
  0xae   : > { %p1462_p2 = por %p1461_p0, %p1460_p13 }
  0xaf   : > { %p1456_p12 = pneg %p1455_p11 }
  0xb1   : > { %p1463_p5 = pnand %p1462_p2, %p1456_p12 }
  0xb3   : > { %1466 = shalt.err (!%p1463_p5)
}
  0xb4   : > { %1186 = dma.hbm_to_vmem [thread:$0]  (!%p1834_p6), %s2277_s4, 16, %s381_s3, [#allocation9]  }
  0xb5   : > { %s1467_s25 = scalar_lea.hbm %s2249_s6, 16 }
  0xb6   : > { %p1468_p7 = scmp.ne.s32.totalorder %s2249_s6, %s1467_s25  ;;  %p1474_p1 = scmp.lt.u32.totalorder %s1467_s25, %s2249_s6 }
  0xb8   : > { %p1470_p9 = pnand %p1468_p7, %p1850_p8 }
  0xba   : > { %p1471_p4 = pneg %p1470_p9 }
  0xbc   : > { %p1476_p3 = pnand %p1474_p1, %p1471_p4 }
  0xbe   : > { %1479 = shalt.err (!%p1476_p3)
}
  0xbf   : > { %s1480_s16 = scalar_lea.vmem %s405_s28, 16  ;;  %s1487_s3 = scalar_lea.vmem %s405_s28, 32 }
  0xc0   : > { %p1481_p10 = scmp.ne.s32.totalorder %s405_s28, %s1480_s16  ;;  %p1488_p13 = scmp.lt.s32.totalorder %s405_s28, %s405_s28 }
  0xc1   : > { %p1489_p0 = scmp.lt.s32.totalorder %s1487_s3, %s1480_s16 }
  0xc2   : > { %p1483_p11 = pnand %p1481_p10, %p1850_p8 }
  0xc3   : > { %p1490_p2 = por %p1489_p0, %p1488_p13 }
  0xc4   : > { %p1484_p12 = pneg %p1483_p11 }
  0xc6   : > { %p1491_p5 = pnand %p1490_p2, %p1484_p12 }
  0xc8   : > { %1494 = shalt.err (!%p1491_p5)
}
  0xc9   : > { %1192 = dma.hbm_to_vmem [thread:$0]  (!%p1834_p6), %s2249_s6, 16, %s405_s28, [#allocation12]  }
  0xca   : > { %s1722_s9 = smov [#allocation16]   ;;  %s1495_s20 = scalar_lea.hbm %s2251_s8, 16 }
  0xcb   : > { %s428_s10 = sshll.u32 %s1722_s9, 4  ;;  %p1496_p7 = scmp.ne.s32.totalorder %s2251_s8, %s1495_s20  ;;  %s429_s10 = int_to_ptr.vmem [resolvable:$true] %s428_s10 }
  0xcc   : > { %p1502_p1 = scmp.lt.u32.totalorder %s1495_s20, %s2251_s8 }
  0xcd   : > { %p1498_p9 = pnand %p1496_p7, %p1850_p8 }
  0xcf   : > { %p1499_p4 = pneg %p1498_p9 }
  0xd1   : > { %p1504_p3 = pnand %p1502_p1, %p1499_p4 }
  0xd3   : > { %1507 = shalt.err (!%p1504_p3)
}
  0xd4   : > { %s1508_s28 = scalar_lea.vmem %s429_s10, 16  ;;  %s1515_s26 = scalar_lea.vmem %s429_s10, 32 }
  0xd5   : > { %p1509_p10 = scmp.ne.s32.totalorder %s429_s10, %s1508_s28  ;;  %p1516_p13 = scmp.lt.s32.totalorder %s429_s10, %s429_s10 }
  0xd6   : > { %p1517_p0 = scmp.lt.s32.totalorder %s1515_s26, %s1508_s28 }
  0xd7   : > { %p1511_p11 = pnand %p1509_p10, %p1850_p8 }
  0xd8   : > { %p1518_p2 = por %p1517_p0, %p1516_p13 }
  0xd9   : > { %p1512_p12 = pneg %p1511_p11 }
  0xdb   : > { %p1519_p5 = pnand %p1518_p2, %p1512_p12 }
  0xdd   : > { %1522 = shalt.err (!%p1519_p5)
}
  0xde   : > { %1198 = dma.hbm_to_vmem [thread:$0]  (!%p1834_p6), %s2251_s8, 16, %s429_s10, [#allocation15]  }
  0xdf   : > { %s2260_s27 = sadd.s32 4294967294, %s1711_s22   ;;  %s47_s1 = sadd.s32 1, %s1707_s21 }
  0xe0   : > { %p49_p8 = scmp.ge.s32.totalorder %s47_s1, 2  ;;  %s56_s29 = sadd.s32 1, %s1699_s19 }
  0xe1   : > { %p63_p7 = scmp.ne.s32.totalorder %s1699_s19, %s1695_s18  ;;  %p64_p9 = scmp.eq.s32.totalorder %s1711_s22, 0 }
  0xe2   : > { %s2308_s1 = smov (%p49_p8, %s47_s1), 0  ;;  %p69_p1 = scmp.ne.s32.totalorder %s1695_s18, %s1691_s17 }
  0xe3   : > { %p2015_p4 = por %p64_p9, %p63_p7  ;;  %s51_s9 = ssub.s32 %s1707_s21, %s2308_s1 }
  0xe4   : > { %p263_p6 = scmp.eq.s32.totalorder %s1820_s23, 1  ;;  %p54_p3 = scmp.eq.s32.totalorder %s51_s9, 0 }
  0xe5   : > { %p2279_p10 = scmp.eq.s32.totalorder %s1820_s23, 0  ;;  %p269_p13 = scmp.eq.s32.totalorder %s2260_s27, 1 }
  0xe6   : > { %p2030_p12 = por %p263_p6, %p63_p7  ;;  %p1221_p2 = scmp.lt.s32.totalorder %s1711_s22, 2 }
  0xe7   : > { %p2026_p11 = por %p2279_p10, %p69_p1  ;;  %p2039_p0 = por %p269_p13, %p69_p1 }
  0xe8   : > { %s2281_s11 = scalar_select %p2030_p12, 1, 0 }
  0xe9   : > { %s2037_s12 = scalar_select %p54_p3, %s1699_s19, %s56_s29  }
  0xea   : > { %s2282_s20 = scalar_select %p2039_p0, 1, 0 }
  0xeb   : > { %s439_s25 = sand.u32 1, %s1699_s19   ;;  %s1065_s15 = sshll.u32 %s1707_s21, 7 }
  0xec   : > { %s1064_s13 = sshll.u32 %s439_s25, 3  ;;  %s2283_s0 = sld [smem:[#allocation29_spill]] }
  0xed   : > { %s443_s16 = scalar_lea.vmem [#allocation2], %s1064_s13  ;;  %p2053_p5 = pnand %p1221_p2, %p2015_p4 }
  0xee   : > { %s451_s3 = sshll.u32 %s443_s16, 4  ;;  %s440_s9 = scalar_lea.sflag [#allocation3], %s439_s25  ;;  %s2057_s3 = int_to_ptr.vmem [resolvable:$true] %s451_s3 }
  0xef   : > { %p1525_p7 = pneg %p2053_p5 }
  0xf2   : > { %s2049_s26 = scalar_lea.hbm %s2283_s0, %s1065_s15  ;;  %s1528_s30 = scalar_lea.hbm %s2283_s0, 256 }
  0xf3   : > { %s1523_s27 = scalar_lea.hbm %s2049_s26, 128  ;;  %p1529_p4 = scmp.lt.u32.totalorder %s2049_s26, %s2283_s0 }
  0xf4   : > { %p1524_p8 = scmp.ne.s32.totalorder %s2049_s26, %s1523_s27  ;;  %p1530_p6 = scmp.lt.u32.totalorder %s1528_s30, %s1523_s27 }
  0xf5   : > { %p1532_p10 = scmp.lt.u32.totalorder %s1523_s27, %s2049_s26 }
  0xf6   : > { %p1526_p9 = pnand %p1525_p7, %p1524_p8  ;;  %p1531_p3 = por %p1530_p6, %p1529_p4 }
  0xf8   : > { %p1527_p1 = pneg %p1526_p9  ;;  %p1533_p13 = por %p1532_p10, %p1531_p3 }
  0xfa   : > { %p1534_p2 = pnand %p1533_p13, %p1527_p1 }
  0xfc   : > { %1537 = shalt.err (!%p1534_p2)
}
  0xfd   : > { %s1538_s25 = scalar_lea.vmem %s2057_s3, 128  ;;  %s1723_s16 = smov [#allocation2]  }
  0xfe   : > { %p1539_p8 = scmp.ne.s32.totalorder %s2057_s3, %s1538_s25  ;;  %s1543_s15 = sshll.u32 %s1723_s16, 4  ;;  %s1544_s15 = int_to_ptr.vmem [resolvable:$false] %s1543_s15 }
  0xff   : > { %s1545_s13 = scalar_lea.vmem %s1544_s15, 256  ;;  %p1546_p12 = scmp.lt.s32.totalorder %s2057_s3, %s1544_s15 }
 0x100   : > { %p1541_p9 = pnand %p1539_p8, %p1525_p7  ;;  %p1547_p4 = scmp.lt.s32.totalorder %s1545_s13, %s1538_s25 }
 0x102   : > { %p1542_p0 = pneg %p1541_p9  ;;  %p1548_p6 = por %p1547_p4, %p1546_p12 }
 0x104   : > { %p1549_p3 = pnand %p1548_p6, %p1542_p0 }
 0x106   : > { %1552 = shalt.err (!%p1549_p3)
}
 0x107   : > { %1202 = dma.hbm_to_vmem [thread:$0]  (!%p2053_p5), %s2049_s26, 128, %s2057_s3, %s440_s9  }
 0x108   : > { %p2285_p1 = scmp.ne.s32.totalorder %s2271_s24, 0 }
 0x109   : > { %s2087_s27 = sand.u32 (!%p2285_p1), 1, %s1695_s18  }
 0x10a   : > { %460 = sbr.rel (%p2285_p1) target bundleno = 880 (0x370), region = 56  ;;  %s1067_s30 = sshll.u32 (!%p2285_p1), %s2087_s27, 3 }
 0x10b   : > { %s463_s14 = scalar_lea.sflag (!%p2285_p1), [#allocation3], %s2087_s27  ;;  %s466_s28 = scalar_lea.vmem (!%p2285_p1), [#allocation2], %s1067_s30 }
 0x111   : > { %1662 = dma.done.wait (%p2026_p11), %s463_s14, 128  }
 0x112   : > { %1664 = vsyncadd (%p2026_p11), %s463_s14, 4294967168  ;;  %p2286_p12 = scmp.eq.s32.totalorder %s1820_s23, 0 }
 0x114   : > { %1666 = dma.done.wait (%p2286_p12), [#allocation6], 32   ;;  %p2287_p0 = pmov %p2286_p12 }
 0x116   : > { %1668 = vsyncadd (%p2287_p0), [#allocation6], 4294967264  ;;  %p2288_p5 = pmov %p2287_p0 }
 0x117   : > { %p2289_p7 = pmov %p2287_p0 }
 0x118   : > { %1670 = dma.done.wait (%p2288_p5), [#allocation9], 272  }
 0x119   : > { %1672 = vsyncadd (%p2289_p7), [#allocation9], 4294967024  ;;  %p2290_p10 = pmov %p2287_p0 }
 0x11a   : > { %p2291_p13 = pmov %p2287_p0 }
 0x11b   : > { %1674 = dma.done.wait (%p2290_p10), [#allocation12], 272  }
 0x11c   : > { %1676 = vsyncadd (%p2291_p13), [#allocation12], 4294967024  ;;  %p2292_p11 = pmov %p2287_p0 }
 0x11d   : > { %p2293_p2 = pmov %p2287_p0 }
 0x11e   : > { %1678 = dma.done.wait (%p2292_p11), [#allocation15], 272  }
 0x11f   : > { %1680 = vsyncadd (%p2293_p2), [#allocation15], 4294967024  ;;  %vm551_vm0 = vcmask 261120   ;;  %v548_v0 = vld [vmem:[%s466_s28] sm:$0xff]  ;;  %v1291_v7 = vld [vmem:[#allocation8] sm:$0xff]   ;;  %v1724_v9 = vmov 0.0  }
 0x120   : > { %v552_v1 = vsel %vm551_vm0, %v548_v0, 0.0  ;;  %v1292_v8 = vld [vmem:[#allocation11] sm:$0xff]   ;;  %1110 = vmatprep.subr.bf16.mxu0 %v1724_v9  ;;  %1118 = vmatprep.subr.bf16.mxu1 %v1724_v9  ;;  %v1293_v10 = vld [vmem:[#allocation8 + $0x8] sm:$0xff]   ;;  %v1294_v11 = vld [vmem:[#allocation11 + $0x8] sm:$0xff]   ;;  %vm1725_vm1 = vmmov 0   ;;  %s2294_s24 = sld [smem:[#allocation28_spill]] }
 0x121   : > { %553 = vadd.xlane.f32.xlu0 %v552_v1  ;;  %1111 = vmatpush3.bf16.msra.mxu0 %v1291_v7  ;;  %v1079_v16 = vld [vmem:[#allocation5] ss:$0 sm:$0xff]  ;;  %v1080_v18 = vld [vmem:[#allocation7] ss:$0 sm:$0xff]  ;;  %v1295_v21 = vld [vmem:[#allocation14] sm:$0xff]   ;;  %s2120_s10 = sshll.u32 %s2087_s27, 2 }
 0x122   : > { %1119 = vmatpush3.bf16.msra.mxu1 %v1292_v8  ;;  %1112 = vmatprep.subr.bf16.mxu0 %v1724_v9  ;;  %v1296_v23 = vld [vmem:[#allocation14 + $0x8] sm:$0xff]   ;;  %v1085_v25 = vld [vmem:[#allocation13] ss:$0 sm:$0xff]  ;;  %s785_s26 = sand.u32 1, %s1820_s23   ;;  %s539_s29 = scalar_lea.vmem [#allocation18], %s2120_s10  ;;  %vm774_vm2 = vcmask 257024  }
 0x123   : > { %1120 = vmatprep.subr.bf16.mxu1 %v1724_v9  ;;  %1114 = vmatprep.mubr.msk.bf16.mxu0 %vm1725_vm1, %v1724_v9  ;;  %v1081_v24 = vld [vmem:[#allocation10] ss:$0 sm:$0xff]  ;;  %s819_s9 = sshll.u32 %s539_s29, 4  ;;  %s532_s25 = scalar_lea.vmem [#allocation17], %s2120_s10  ;;  %v1089_v38 = vld [vmem:[#allocation16] ss:$0 sm:$0xff]  ;;  %s2134_s9 = int_to_ptr.vmem [resolvable:$true] %s819_s9 }
 0x124   : > { %1122 = vmatprep.mubr.msk.bf16.mxu1 %vm1725_vm1, %v1724_v9  ;;  %s805_s16 = sshll.u32 %s532_s25, 4  ;;  %s2295_s13 = sld [smem:[#allocation35_spill]]  ;;  %s2142_s16 = int_to_ptr.vmem [resolvable:$true] %s805_s16 }
 0x125   : > { %1113 = vmatpush3.bf16.msra.mxu0 %v1293_v10  ;;  %s2146_s15 = scalar_lea.sflag [#allocation19], %s785_s26  ;;  %s1553_s23 = scalar_lea.vmem %s2134_s9, 64 }
 0x126   : > { %1121 = vmatpush3.bf16.msra.mxu1 %v1294_v11  ;;  %1126 = vmatprep.subr.bf16.mxu0 %v1724_v9  ;;  %s2124_s3 = sshll.u32 %s2294_s24, 6  ;;  %s2296_s24 = sld [smem:[#allocation34_spill]] }
 0x127   : > { %p1554_p8 = scmp.ne.s32.totalorder %s2134_s9, %s1553_s23  ;;  %p2297_p9 = scmp.ne.s32.totalorder %s2281_s11, 0 }
 0x128   : > { %s1726_s14 = smov [#allocation18]  }
 0x129   : > { %p1555_p4 = pnand %p1554_p8, %p2297_p9  ;;  %s1557_s28 = sshll.u32 %s1726_s14, 4  ;;  %s1558_s28 = int_to_ptr.vmem [resolvable:$false] %s1557_s28 }
 0x12a   : > { %s2132_s30 = scalar_lea.hbm %s2295_s13, %s2124_s3  ;;  %s1559_s2 = scalar_lea.vmem %s1558_s28, 128 }
 0x12b   : > { %p1556_p6 = pneg %p1555_p4  ;;  %p1560_p3 = scmp.lt.s32.totalorder %s2134_s9, %s1558_s28 }
 0x12c   : > { %s2140_s0 = scalar_lea.hbm %s2296_s24, %s2124_s3  ;;  %p1561_p1 = scmp.lt.s32.totalorder %s1559_s2, %s1553_s23 }
 0x12e   : > { %p1562_p12 = por %p1561_p1, %p1560_p3 }
 0x130   : > { %p1563_p0 = pnand %p1562_p12, %p1556_p6 }
 0x1ae   : > { %v554_v2 = vpop.xlane.xlu0 %553 }
 0x1af   : > { %v556_v3 = vmul.f32 0.03125, %v554_v2 }
 0x1b1   : > { %v557_v4 = vsub.f32 %v548_v0, %v556_v3 }
 0x1b3   : > { %v558_v5 = vmul.f32 %v557_v4, %v557_v4 }
 0x1b5   : > { %v559_v6 = vsel %vm551_vm0, %v558_v5, 0.0 }
 0x1b6   : > { %560 = vadd.xlane.f32.xlu0 %v559_v6 }
 0x243   : > { %v561_v12 = vpop.xlane.xlu0 %560 }
 0x244   : > { %v562_v13 = vmul.f32 0.03125, %v561_v12 }
 0x246   : > { %v563_v14 = vadd.f32 1e-05, %v562_v13 }
 0x248   : > { %1297 = vrsqrt.f32 %v563_v14 }
 0x252   : > { %v1298_v15 = vpop.eup %1297 }
 0x253   : > { %v565_v17 = vmul.f32 %v1298_v15, %v557_v4 }
 0x255   : > { %v572_v19 = vmul.f32 %v1079_v16, %v565_v17 }
 0x257   : > { %v579_v20 = vadd.f32 %v1080_v18, %v572_v19 }
 0x259   : > { %v580_v22 = vpack.c.bf16 %v579_v20, %v579_v20 }
 0x25b   : > { %1115 = vmatmul.mubr.msk.bf16.vlgmr.msra.gmra.mrb[0].mxu0 %vm551_vm0, %v580_v22  ;;  %1123 = vmatmul.mubr.msk.bf16.vlgmr.msra.gmra.mrb[0].mxu1 %vm551_vm0, %v580_v22 }
 0x25c   : > { %1127 = vmatpush3.bf16.msra.mxu0 %v1295_v21  ;;  %1130 = vmatprep.mubr.msk.bf16.mxu0 %vm1725_vm1, %v1724_v9 }
 0x25d   : > { %1128 = vmatprep.subr.bf16.mxu0 %v1724_v9 }
 0x260   : > { %1129 = vmatpush3.bf16.msra.mxu0 %v1296_v23 }
 0x263   : > { %1131 = vmatmul.mubr.msk.bf16.vlgmr.msra.gmra.mrb[4].mxu0 %vm551_vm0, %v580_v22 }
 0x32e   : > { %v641_v26 = vpop.f32.mrb[0].mxu0  ;;  %v704_v27 = vpop.f32.mrb[0].mxu1 }
 0x32f   : > { %v642_v28 = vadd.f32 %v1081_v24, %v641_v26  ;;  %v705_v29 = vadd.f32 %v1085_v25, %v704_v27  ;;  %v1116_v30 = vpop.f32.mrb[1].mxu0  ;;  %v1124_v31 = vpop.f32.mrb[1].mxu1 }
 0x330   : > { %v644_v32 = vpop.f32.mrb[2].mxu0  ;;  %v707_v33 = vpop.f32.mrb[2].mxu1 }
 0x331   : > { %v773_v34 = vpack.c.bf16 %v642_v28, %v642_v28  ;;  %v776_v35 = vpack.c.bf16 %v705_v29, %v705_v29  ;;  %v1117_v36 = vpop.f32.mrb[3].mxu0  ;;  %v1125_v37 = vpop.f32.mrb[3].mxu1 }
 0x333   : > { %777 = vst.msk [vmem:[%s539_s29] sm:$0xf] %vm774_vm2, %v776_v35  ;;  %775 = vst.msk [vmem:[%s532_s25] sm:$0xf] %vm774_vm2, %v773_v34 }
 0x334   : > { %1566 = shalt.err (!%p1563_p0)
}
 0x335   : > { %s1567_s26 = scalar_lea.hbm %s2132_s30, 64  ;;  %s1571_s14 = scalar_lea.hbm %s2295_s13, 128 }
 0x336   : > { %p1568_p5 = scmp.ne.s32.totalorder %s2132_s30, %s1567_s26  ;;  %p1572_p13 = scmp.lt.u32.totalorder %s2132_s30, %s2295_s13 }
 0x337   : > { %p1573_p11 = scmp.lt.u32.totalorder %s1571_s14, %s1567_s26  ;;  %p1575_p8 = scmp.lt.u32.totalorder %s1567_s26, %s2132_s30 }
 0x338   : > { %p1569_p7 = pnand %p1568_p5, %p2297_p9 }
 0x339   : > { %p1574_p2 = por %p1573_p11, %p1572_p13 }
 0x33a   : > { %p1570_p10 = pneg %p1569_p7 }
 0x33b   : > { %p1576_p4 = por %p1575_p8, %p1574_p2 }
 0x33d   : > { %p1577_p6 = pnand %p1576_p4, %p1570_p10 }
 0x33f   : > { %1580 = shalt.err (!%p1577_p6)
}
 0x340   : > { %1169 = dma.vmem_to_hbm [thread:$0]  (%p2297_p9), %s2134_s9, 64, %s2132_s30, %s2146_s15  }
 0x341   : > { %s781_s2 = scalar_lea.sflag [#allocation4], %s2087_s27  ;;  %s1581_s4 = scalar_lea.vmem %s2142_s16, 64 }
 0x342   : > { %p1582_p3 = scmp.ne.s32.totalorder %s2142_s16, %s1581_s4  ;;  %s1727_s23 = smov [#allocation17]  }
 0x343   : > { %s1585_s26 = sshll.u32 %s1727_s23, 4  ;;  %s1586_s26 = int_to_ptr.vmem [resolvable:$false] %s1585_s26 }
 0x344   : > { %p1583_p1 = pnand %p1582_p3, %p2297_p9  ;;  %s1587_s29 = scalar_lea.vmem %s1586_s26, 128 }
 0x345   : > { %p1588_p0 = scmp.lt.s32.totalorder %s2142_s16, %s1586_s26  ;;  %p1589_p5 = scmp.lt.s32.totalorder %s1587_s29, %s1581_s4 }
 0x346   : > { %p1584_p12 = pneg %p1583_p1 }
 0x347   : > { %p1590_p7 = por %p1589_p5, %p1588_p0 }
 0x349   : > { %p1591_p10 = pnand %p1590_p7, %p1584_p12 }
 0x34b   : > { %1594 = shalt.err (!%p1591_p10)
}
 0x34c   : > { %s1595_s27 = scalar_lea.hbm %s2140_s0, 64  ;;  %s1599_s25 = scalar_lea.hbm %s2296_s24, 128 }
 0x34d   : > { %p1596_p13 = scmp.ne.s32.totalorder %s2140_s0, %s1595_s27  ;;  %p1600_p8 = scmp.lt.u32.totalorder %s2140_s0, %s2296_s24 }
 0x34e   : > { %p1601_p4 = scmp.lt.u32.totalorder %s1599_s25, %s1595_s27  ;;  %p1603_p3 = scmp.lt.u32.totalorder %s1595_s27, %s2140_s0 }
 0x34f   : > { %p1597_p11 = pnand %p1596_p13, %p2297_p9 }
 0x350   : > { %p1602_p6 = por %p1601_p4, %p1600_p8 }
 0x351   : > { %p1598_p2 = pneg %p1597_p11 }
 0x352   : > { %p1604_p1 = por %p1603_p3, %p1602_p6 }
 0x354   : > { %p1605_p12 = pnand %p1604_p1, %p1598_p2 }
 0x356   : > { %1608 = shalt.err (!%p1605_p12)
}
 0x357   : > { %1168 = dma.vmem_to_hbm [thread:$0]  (%p2297_p9), %s2142_s16, 64, %s2140_s0, %s781_s2   ;;  %v767_v39 = vpop.f32.mrb[4].mxu0 }
 0x358   : > { %s546_s4 = scalar_lea.vmem [#allocation20], %s2120_s10  ;;  %v768_v40 = vadd.f32 %v1089_v38, %v767_v39  ;;  %v1132_v41 = vpop.f32.mrb[5].mxu0  ;;  %s2298_s27 = sld [smem:[#allocation36_spill]] }
 0x359   : > { %s833_s23 = sshll.u32 %s546_s4, 4  ;;  %v770_v42 = vpop.f32.mrb[6].mxu0  ;;  %s1728_s0 = smov [#allocation20]   ;;  %s834_s23 = int_to_ptr.vmem [resolvable:$true] %s833_s23 }
 0x35a   : > { %v778_v43 = vpack.c.bf16 %v768_v40, %v768_v40  ;;  %v1133_v44 = vpop.f32.mrb[7].mxu0  ;;  %s1609_s30 = scalar_lea.vmem %s834_s23, 64  ;;  %s1613_s10 = sshll.u32 %s1728_s0, 4  ;;  %s1614_s10 = int_to_ptr.vmem [resolvable:$false] %s1613_s10 }
 0x35b   : > { %p1610_p0 = scmp.ne.s32.totalorder %s834_s23, %s1609_s30  ;;  %s1615_s16 = scalar_lea.vmem %s1614_s10, 128 }
 0x35c   : > { %779 = vst.msk [vmem:[%s546_s4] sm:$0xf] %vm774_vm2, %v778_v43  ;;  %p1616_p10 = scmp.lt.s32.totalorder %s834_s23, %s1614_s10  ;;  %p1617_p13 = scmp.lt.s32.totalorder %s1615_s16, %s1609_s30 }
 0x35d   : > { %p1611_p5 = pnand %p1610_p0, %p2297_p9 }
 0x35e   : > { %s2197_s9 = scalar_lea.hbm %s2298_s27, %s2124_s3  ;;  %p1618_p11 = por %p1617_p13, %p1616_p10 }
 0x35f   : > { %p1612_p7 = pneg %p1611_p5 }
 0x361   : > { %p1619_p2 = pnand %p1618_p11, %p1612_p7 }
 0x363   : > { %1622 = shalt.err (!%p1619_p2)
}
 0x364   : > { %s1623_s3 = scalar_lea.hbm %s2197_s9, 64  ;;  %s1627_s14 = scalar_lea.hbm %s2298_s27, 128 }
 0x365   : > { %p1624_p8 = scmp.ne.s32.totalorder %s2197_s9, %s1623_s3  ;;  %p1628_p3 = scmp.lt.u32.totalorder %s2197_s9, %s2298_s27 }
 0x366   : > { %p1629_p1 = scmp.lt.u32.totalorder %s1627_s14, %s1623_s3  ;;  %p1631_p0 = scmp.lt.u32.totalorder %s1623_s3, %s2197_s9 }
 0x367   : > { %p1625_p4 = pnand %p1624_p8, %p2297_p9 }
 0x368   : > { %p1630_p12 = por %p1629_p1, %p1628_p3 }
 0x369   : > { %p1626_p6 = pneg %p1625_p4 }
 0x36a   : > { %p1632_p5 = por %p1631_p0, %p1630_p12 }
 0x36c   : > { %p1633_p7 = pnand %p1632_p5, %p1626_p6 }
 0x36e   : > { %1636 = shalt.err (!%p1633_p7)
}
 0x36f   : > { %1170 = dma.vmem_to_hbm [thread:$0]  (%p2297_p9), %s834_s23, 64, %s2197_s9, %s2146_s15  }
 0x370 PF: > { %s845_s26 = sand.u32 1, %s1691_s17   ;;  %p2299_p10 = scmp.ne.s32.totalorder %s2282_s20, 0 }
 0x371   : > { %p2300_p13 = scmp.ge.s32.totalorder %s1711_s22, 2  ;;  %s846_s29 = scalar_lea.sflag [#allocation4], %s845_s26 }
 0x373   : > { %p1204_p11 = pnand %p2300_p13, %p2299_p10 }
 0x375   : > { %1682 = dma.done.wait (!%p1204_p11), %s846_s29, 64  }
 0x376   : > { %1684 = vsyncadd (!%p1204_p11), %s846_s29, 4294967232  ;;  %s2301_s30 = sadd.s32 4294967294, %s1711_s22  }
 0x377   : > { %s854_s0 = sand.u32 1, %s2301_s30  }
 0x378   : > { %s855_s10 = scalar_lea.sflag [#allocation19], %s854_s0 }
 0x379   : > { %1686 = dma.done.wait (!%p1204_p11), %s855_s10, 128  }
 0x37a   : > { %1688 = vsyncadd (!%p1204_p11), %s855_s10, 4294967168  ;;  %s35_s22 = sadd.s32 1, %s1711_s22   ;;  %s2302_s17 = smov %s1695_s18 }
 0x37b   : > { %p32_p9 = scmp.ge.s32.totalorder %s35_s22, 4   ;;  %s2303_s18 = smov %s1699_s19 }
 0x37c   : > { %s2304_s19 = smov %s2037_s12  ;;  %s2305_s20 = smov %s1707_s21 }
 0x37d   : > { %s2306_s21 = smov %s2308_s1  ;;  %34 = sbr.rel (!%p32_p9) target bundleno = 21 (0x15), region = 165 }
 0x384   :  { %869 = vsyncpa [#allocation3], 1 }
 0x385   :  { %871 = vsyncpa [#allocation3 + $0x1], 1 }
 0x386   :  { %872 = vsyncpa [#allocation6], 1 }
 0x387   :  { %873 = vsyncpa [#allocation9], 1 }
 0x388   :  { %874 = vsyncpa [#allocation12], 1 }
 0x389   :  { %875 = vsyncpa [#allocation15], 1 }
 0x38a   :  { %876 = vsyncpa [#allocation4], 1 }
 0x38b   :  { %878 = vsyncpa [#allocation4 + $0x1], 1 }
 0x38c   :  { %879 = vsyncpa [#allocation19], 1 }
 0x38d   :  { %881 = vsyncpa [#allocation19 + $0x1], 1 }

</bundles_post_ra>
